<compile_context>
chip_gen: v6e
topology: v6e:2x2x1
jax: 0.10.0
libtpu: 0.0.40
codegen_flags: <defaults>
</compile_context>

<pallas_src>
import jax
import jax.numpy as jnp
from jax.experimental import pallas as pl
from jax.experimental.pallas import tpu as pltpu


def _copy_kernel(x_ref, o_ref):
    # Whole-tile load/store; Pallas pipelines the HBM<->VMEM DMA across the grid.
    o_ref[...] = x_ref[...]


# Widest-first lane candidates (all multiples of 128).
_LANE_CANDIDATES = (4096, 2048, 1024, 512, 256, 128)
# ~4 MiB per tile buffer: in+out double-buffered ~= 16 MiB, inside the 32 MiB
# limit we request below (physical VMEM: 128 MiB v5e/v6e, 64 MiB v7x).
_TILE_TARGET_BYTES = 4 * 1024 * 1024
# Ragged (1, N) slabs: raw bytes per lane chunk.  Worst-case sublane padding
# (x8 for a 1-row block) keeps each buffer <= 4 MiB.
_RAGGED_TILE_RAW_BYTES = 512 * 1024
_VMEM_LIMIT_BYTES = 32 * 1024 * 1024
# Below this, launching the kernel is strictly slower than doing nothing.
_FAST_PATH_BYTES = 1 * 1024 * 1024
# Above this, force >= 2 grid steps so v7x megacore can shard the copy.
_MULTIBLOCK_MIN_BYTES = 2 * 1024 * 1024


def _sublane_granule(dtype) -> int:
    # f32 -> 8, bf16 -> 16, int8/fp8 -> 32 (sub-32-bit dtypes pack along sublanes).
    itemsize = jnp.dtype(dtype).itemsize
    return max(8, (8 * 4) // max(1, itemsize))


def _compiler_params():
    return pltpu.CompilerParams(
        dimension_semantics=("parallel",),   # each output block written exactly once
        vmem_limit_bytes=_VMEM_LIMIT_BYTES,
    )


def _copy_rows(slab, tile_r, lane):
    """Tiled copy of a (rows, lane) slab, blocked along the row (sublane) axis."""
    rows = slab.shape[0]
    return pl.pallas_call(
        _copy_kernel,
        out_shape=jax.ShapeDtypeStruct(slab.shape, slab.dtype),
        grid_spec=pl.GridSpec(
            grid=(pl.cdiv(rows, tile_r),),
            in_specs=[pl.BlockSpec((tile_r, lane), lambda i: (i, 0))],
            out_specs=pl.BlockSpec((tile_r, lane), lambda i: (i, 0)),
        ),
        compiler_params=_compiler_params(),
    )(slab)


def _copy_lane_chunks(slab, block_elems):
    """Tiled copy of a (1, total) slab, blocked along the lane axis."""
    total = slab.shape[1]
    return pl.pallas_call(
        _copy_kernel,
        out_shape=jax.ShapeDtypeStruct(slab.shape, slab.dtype),
        grid_spec=pl.GridSpec(
            grid=(pl.cdiv(total, block_elems),),
            in_specs=[pl.BlockSpec((1, block_elems), lambda i: (0, i))],
            out_specs=pl.BlockSpec((1, block_elems), lambda i: (0, i)),
        ),
        compiler_params=_compiler_params(),
    )(slab)


def _pallas_identity(x, *, force_kernel=False):
    """Streams x through a tiled Pallas copy kernel; returns a copy of x.

    Test-only utility: the module's forward() does NOT call this (the reference
    forward is an empty stub that returns None).
    """
    orig_shape = x.shape
    total = x.size
    if total == 0:
        return x

    itemsize = jnp.dtype(x.dtype).itemsize
    nbytes = total * itemsize
    if not force_kernel and nbytes < _FAST_PATH_BYTES:
        # Kernel launch + per-step overhead dominates for tiny tensors.
        return x

    # Pick a lane-dense last dim without materializing any padded copy.
    lane = None
    for cand in _LANE_CANDIDATES:
        if total % cand == 0:
            lane = cand
            break

    if lane is None:
        # Ragged element count: (1, total) slab tiled along the lane axis in
        # 1024-element-multiple chunks (unmasked full-width stores except for
        # the masked tail block).  Chunk sized against worst-case (8,128)
        # sublane padding so VMEM stays well inside the requested limit.
        slab = x.reshape(1, total)
        block_elems = max(1024, ((_RAGGED_TILE_RAW_BYTES // itemsize) // 1024) * 1024)
        if block_elems >= total:
            block_elems = total  # single full-extent lane block (always allowed)
        out = _copy_lane_chunks(slab, block_elems)
        return out.reshape(orig_shape)

    rows = total // lane
    # Metadata-only reshape of a contiguous array — no extra HBM traffic.
    slab = x.reshape(rows, lane)

    granule = _sublane_granule(x.dtype)
    bytes_per_row = lane * itemsize
    tile_r = max(1, _TILE_TARGET_BYTES // bytes_per_row)
    tile_r = max(granule, (tile_r // granule) * granule)

    if tile_r >= rows:
        if nbytes >= _MULTIBLOCK_MIN_BYTES and rows >= 2 * granule:
            # Large array: force at least 2 grid steps so the "parallel" axis
            # can shard across v7x's two TensorCores and keep both DMA queues
            # busy (also exercises prefetch/writeback overlap).
            half = pl.cdiv(rows, 2)
            tile_r = ((half + granule - 1) // granule) * granule
            tile_r = min(tile_r, rows)
        else:
            tile_r = rows  # single full-extent block (always allowed)

    out = _copy_rows(slab, tile_r, lane)
    return out.reshape(orig_shape)


class MultiFiberNetworkPallas:
    """JAX/Pallas counterpart of the (empty) PyTorch MultiFiberNetwork."""

    def __init__(self):
        # Reference __init__ registers no parameters — nothing to initialize.
        pass

    def forward(self, x):
        # TODO(synk): reference forward() is `pass` — no computation, returns
        # None.  Per perf review we do NOT launch the (discarded) copy kernel
        # here: that would be 2x nbytes of dead HBM traffic.  The Pallas copy
        # path lives in _pallas_identity for explicit tests only.
        del x
        return None


if __name__ == "__main__":
    key = jax.random.PRNGKey(0)
    k0, k1, k2, k3, k4 = jax.random.split(key, 5)

    # Small NCHW input consistent with a conv-style network (force the kernel
    # path so the single-block lane-dense case is exercised on TPU).
    x = jax.random.normal(k0, (2, 4, 16, 16), dtype=jnp.float32)
    y = jax.block_until_ready(_pallas_identity(x, force_kernel=True))
    assert y.shape == x.shape and y.dtype == x.dtype
    assert bool(jnp.all(y == x))

    # Larger f32 input: multi-step (>= 2 blocks) pipelined / megacore-shardable grid.
    x2 = jax.random.normal(k1, (8, 32, 64, 64), dtype=jnp.float32)
    y2 = jax.block_until_ready(_pallas_identity(x2))
    assert bool(jnp.all(y2 == x2))

    # bf16 input: exercises the dtype-dependent (16-row) sublane granule.
    x3 = jax.random.normal(k2, (8, 16, 128, 128), dtype=jnp.bfloat16)
    y3 = jax.block_until_ready(_pallas_identity(x3))
    assert bool(jnp.all(y3 == x3))

    # Small ragged element count: single full-extent (1, total) block.
    x4 = jax.random.normal(k3, (2, 3, 17, 19), dtype=jnp.float32)
    y4 = jax.block_until_ready(_pallas_identity(x4, force_kernel=True))
    assert bool(jnp.all(y4 == x4))

    # Larger ragged element count: lane-chunked path with a masked tail block.
    x5 = jax.random.normal(k4, (3, 1031, 173), dtype=jnp.float32)
    y5 = jax.block_until_ready(_pallas_identity(x5, force_kernel=True))
    assert bool(jnp.all(y5 == x5))

    # Module-level forward matches the reference: returns None, launches nothing.
    model = MultiFiberNetworkPallas()
    assert model.forward(x) is None

    print("KERNEL_OK")
</pallas_src>

<mosaic_0001>
module attributes {stable_mosaic.version = 11 : i64} {
  func.func @_copy_kernel(%arg0: i32, %arg1: memref<1x2048xf32, #tpu.memory_space<vmem>>, %arg2: memref<1x2048xf32, #tpu.memory_space<vmem>>) attributes {dimension_semantics = [#tpu.dimension_semantics<parallel>], iteration_bounds = array<i64: 1>, scalar_prefetch = 0 : i64, scratch_operands = 0 : i64, tpu.core_type = #tpu.core_type<tc>, window_params = [{transform_indices = @transform_0, window_bounds = array<i64: 1, 2048>}, {transform_indices = @transform_1, window_bounds = array<i64: 1, 2048>}]} {
    %c0 = arith.constant 0 : index
    %c0_0 = arith.constant 0 : index
    %0 = vector.load %arg1[%c0, %c0_0] : memref<1x2048xf32, #tpu.memory_space<vmem>>, vector<1x2048xf32>
    %c0_1 = arith.constant 0 : index
    %c0_2 = arith.constant 0 : index
    %1 = vector.load %arg2[%c0_1, %c0_2] : memref<1x2048xf32, #tpu.memory_space<vmem>>, vector<1x2048xf32>
    tpu.vector_store %arg2[%c0_1, %c0_2], %0 {strides = array<i32>} : memref<1x2048xf32, #tpu.memory_space<vmem>>, vector<1x2048xf32>,
    return
  }
  func.func @transform_0(%arg0: i32) -> (i32, i32) {
    %c0_i32 = arith.constant 0 : i32
    %c0_i32_0 = arith.constant 0 : i32
    return %arg0, %c0_i32 : i32, i32
  }
  func.func @transform_1(%arg0: i32) -> (i32, i32) {
    %c0_i32 = arith.constant 0 : i32
    %c0_i32_0 = arith.constant 0 : i32
    return %arg0, %c0_i32 : i32, i32
  }
}

</mosaic_0001>

<bundles_post_ra>
// kernel: tpu_custom_call.1
= control target key start
LH: loop header
LB: loop body
LE: loop exit
PB: predicated region body
PF: predicated region fallthrough
CT: control target
= control target key end

     0   :  { %6 = vsyncpa [#allocation3], 0  ;;  %s104_s0 = inlined_call_operand.hbm [shape: f32[1,2048], index: 0, kind: input, shape index: {}]   ;;  %s105_s1 = inlined_call_operand.hbm [shape: f32[1,2048], index: 1, kind: output, shape index: {}]  }
   0x1   :  { %7 = vsyncpa [#allocation4], 0  ;;  %s86_s6 = smov [#allocation2]  }
   0x2   :  { %s14_s7 = sshll.u32 %s86_s6, 4  ;;  %s15_s7 = int_to_ptr.vmem [resolvable:$true] %s14_s7 }
   0x3   :  { %s50_s8 = scalar_lea.vmem %s15_s7, 256  ;;  %p55_p1 = scmp.lt.s32.totalorder %s15_s7, %s15_s7 }
   0x4   :  { %p51_p0 = scmp.ne.s32.totalorder %s15_s7, %s50_s8  ;;  %p56_p2 = scmp.lt.s32.totalorder %s50_s8, %s50_s8 }
   0x6   :  { %p57_p3 = por %p56_p2, %p55_p1 }
   0x8   :  { %p58_p4 = pnand %p57_p3, %p51_p0 }
   0xa   :  { %61 = shalt.err (!%p58_p4)
}
   0xb   :  { %17 = dma.hbm_to_vmem [thread:$0]  %s104_s0, 256, %s15_s7, [#allocation3]  }
   0xc   :  { %82 = dma.done.wait [#allocation3], 256  }
   0xd   :  { %83 = vsyncadd [#allocation3], 4294967040  ;;  %s87_s11 = smov [#allocation5]   ;;  %v21_v0 = vld [vmem:[#allocation2] sm:$0xff]  ;;  %v22_v1 = vld [vmem:[#allocation2 + $0x8] sm:$0xff] }
   0xe   :  { %s31_s12 = sshll.u32 %s87_s11, 4  ;;  %23 = vst [vmem:[#allocation5] sm:$0xff] %v21_v0  ;;  %24 = vst [vmem:[#allocation5 + $0x8] sm:$0xff] %v22_v1  ;;  %s32_s12 = int_to_ptr.vmem [resolvable:$true] %s31_s12 }
   0xf   :  { %s62_s13 = scalar_lea.vmem %s32_s12, 256  ;;  %p67_p6 = scmp.lt.s32.totalorder %s32_s12, %s32_s12 }
  0x10   :  { %p63_p5 = scmp.ne.s32.totalorder %s32_s12, %s62_s13  ;;  %p68_p7 = scmp.lt.s32.totalorder %s62_s13, %s62_s13 }
  0x12   :  { %p69_p8 = por %p68_p7, %p67_p6 }
  0x14   :  { %p70_p9 = pnand %p69_p8, %p63_p5 }
  0x16   :  { %73 = shalt.err (!%p70_p9)
}
  0x17   :  { %34 = dma.vmem_to_hbm [thread:$0]  %s32_s12, 256, %s105_s1, [#allocation4]  }
  0x18   :  { %84 = dma.done.wait [#allocation4], 256  }
  0x19   :  { %85 = vsyncadd [#allocation4], 4294967040 }
  0x1a   :  { %38 = vsyncpa [#allocation3], 1 }
  0x1b   :  { %39 = vsyncpa [#allocation4], 1 }

</bundles_post_ra>
